<compile_context>
chip_gen: v6e
topology: v6e:2x2x1
jax: 0.10.0
libtpu: 0.0.40
codegen_flags: <defaults>
</compile_context>

<pallas_src>
import functools

import jax
import jax.numpy as jnp
import numpy as np
from jax.experimental import pallas as pl
from jax.experimental.pallas import tpu as pltpu


# ------------------------------ helpers -------------------------------------

def _round_up(n, m):
    return ((n + m - 1) // m) * m


def _default_block_rows(B):
    """Large sublane-aligned row tile, but always >= 2 grid steps when B > 8."""
    cap = 1024
    if B > 8:
        cap = min(cap, _round_up((B + 1) // 2, 8))   # >= 2 grid steps (v7x megacore)
    return max(8, min(cap, _round_up(B, 8)))


# ----------------------------- Pallas kernel --------------------------------

def mlp_words_kernel(x_ref, w1_ref, b1_ref, wo_ref, bo_ref,
                     y_ref, diff_ref, x1_ref, x2_ref, *, half):
    """Fused MLP_WORDS forward for one batch-row tile.

    `half` is the lane-aligned (multiple-of-128) width of each input half.
    """
    rows = x_ref.shape[0]

    # Static, lane-aligned split of the input tile into its two halves.
    xa = x_ref[:, :half]
    xb = x_ref[:, half:]

    w1 = w1_ref[...]
    b1 = b1_ref[...]

    if rows < 512:
        # Small tiles: one MXU pass over the stacked halves — w1 is pushed into
        # the MXU weight registers once and the doubled M length amortizes
        # fill/drain (most valuable on v5e's 4x128^2 MXU and at small tiles).
        h = jnp.dot(jnp.concatenate([xa, xb], axis=0), w1,
                    preferred_element_type=jnp.float32)
        h = jnp.maximum(h + b1, 0.0)
        x1 = h[:rows]
        x2 = h[rows:]
    else:
        # Large tiles: the concat copy isn't worth it; issue two dots.
        x1 = jnp.maximum(
            jnp.dot(xa, w1, preferred_element_type=jnp.float32) + b1, 0.0)
        x2 = jnp.maximum(
            jnp.dot(xb, w1, preferred_element_type=jnp.float32) + b1, 0.0)

    # Store intermediates as soon as they exist (shorter live ranges, stores
    # interleave under the remaining matmul / VPU work).
    x1_ref[...] = x1
    x2_ref[...] = x2

    d = (x1 - x2) ** 2
    diff_ref[...] = d

    logits = jnp.dot(d, wo_ref[...],
                     preferred_element_type=jnp.float32) + bo_ref[...]
    y_ref[...] = jax.nn.sigmoid(logits)


# ------------------------------- Wrapper -------------------------------------

def mlp_words_forward(x, params, *, block_rows=None):
    """Fused forward pass. Returns (y, [diff, x1, x2]) like the PyTorch module."""
    B, input_dim = x.shape
    half = input_dim // 2
    w1, b1 = params["w1"], params["b1"]
    w_out, b_out = params["w_out"], params["b_out"]
    hidden = w1.shape[1]
    out_dim = w_out.shape[1]

    # Lane-align each input half (a static slice at a non-128-aligned lane
    # offset would force an XLU relayout of the whole x tile every grid step).
    half_p = _round_up(half, 128)

    if block_rows is None:
        block_rows = _default_block_rows(B)
    block_rows = max(8, _round_up(block_rows, 8))
    B_p = _round_up(B, block_rows)
    grid = (B_p // block_rows,)

    # Zero-pad batch rows / half widths when needed.  Zero rows/lanes are inert
    # through the matmuls; padded output rows are sliced off below.
    if half_p != half or B_p != B:
        x_p = jnp.zeros((B_p, 2 * half_p), x.dtype)
        x_p = x_p.at[:B, :half].set(x[:, :half])
        x_p = x_p.at[:B, half_p:half_p + half].set(x[:, half:])
    else:
        x_p = x
    if half_p != half:
        w1_p = jnp.zeros((half_p, hidden), w1.dtype).at[:half, :].set(w1)
    else:
        w1_p = w1

    kernel = functools.partial(mlp_words_kernel, half=half_p)

    row_spec = lambda width: pl.BlockSpec((block_rows, width), lambda i: (i, 0))
    # Whole array, same block index every grid step -> VMEM-resident weights.
    const_spec = lambda arr: pl.BlockSpec(arr.shape, lambda i: (0, 0))

    itemsize = jnp.dtype(jnp.float32).itemsize
    x_tile_bytes = block_rows * 2 * half_p * itemsize
    out_tile_bytes = block_rows * (3 * hidden + out_dim) * itemsize
    weight_bytes = (half_p * hidden + hidden + hidden * out_dim + out_dim) * itemsize
    # Double-buffered streaming tiles + (conservatively double-buffered) weights
    # + headroom for compiler-internal scratch.  Tight on purpose: 64 MiB would
    # be the entire per-TC VMEM on v7x.
    vmem_limit = int(1.25 * (2 * (x_tile_bytes + out_tile_bytes)
                             + 2 * weight_bytes)) + (2 << 20)

    flops = B_p * (4 * half_p * hidden + 2 * hidden * out_dim)
    bytes_accessed = itemsize * (B_p * 2 * half_p
                                 + half_p * hidden + hidden
                                 + hidden * out_dim + out_dim
                                 + B_p * out_dim + 3 * B_p * hidden)

    y, diff, x1, x2 = pl.pallas_call(
        kernel,
        out_shape=(
            jax.ShapeDtypeStruct((B_p, out_dim), jnp.float32),
            jax.ShapeDtypeStruct((B_p, hidden), jnp.float32),
            jax.ShapeDtypeStruct((B_p, hidden), jnp.float32),
            jax.ShapeDtypeStruct((B_p, hidden), jnp.float32),
        ),
        grid=grid,
        in_specs=[
            row_spec(2 * half_p),      # x (padded)
            const_spec(w1_p),          # w1
            const_spec(b1),            # b1
            const_spec(w_out),         # w_out
            const_spec(b_out),         # b_out
        ],
        out_specs=(
            row_spec(out_dim),         # y
            row_spec(hidden),          # diff
            row_spec(hidden),          # x1
            row_spec(hidden),          # x2
        ),
        compiler_params=pltpu.CompilerParams(
            dimension_semantics=("parallel",),
            vmem_limit_bytes=vmem_limit,
        ),
        cost_estimate=pl.CostEstimate(
            flops=flops,
            transcendentals=B_p * out_dim,   # sigmoid
            bytes_accessed=bytes_accessed,
        ),
    )(x_p, w1_p, b1, w_out, b_out)

    if B_p != B:
        y, diff, x1, x2 = y[:B], diff[:B], x1[:B], x2[:B]
    return y, [diff, x1, x2]


# --------------------------- Parameter init ----------------------------------

def linear_init(key, fan_in, fan_out):
    """PyTorch-style Linear init, stored as [in, out] plus [1, out] bias."""
    kw, kb = jax.random.split(key)
    bound = 1.0 / np.sqrt(fan_in)
    w = jax.random.uniform(kw, (fan_in, fan_out), jnp.float32, -bound, bound)
    b = jax.random.uniform(kb, (1, fan_out), jnp.float32, -bound, bound)
    return w, b


def make_params(key, input_dim, hidden, out_dim):
    half = input_dim // 2
    k1, k2, k3 = jax.random.split(key, 3)
    w1, b1 = linear_init(k1, half, hidden)
    # linear2 exists in the PyTorch module but is unused in forward; kept for
    # parameter-count fidelity only.
    w2, b2 = linear_init(k2, half, hidden)
    w_out, b_out = linear_init(k3, hidden, out_dim)
    return dict(w1=w1, b1=b1, w2_unused=w2, b2_unused=b2,
                w_out=w_out, b_out=b_out)


# --------------------------- Pure-JAX reference -------------------------------

def reference_forward(x, params):
    half = x.shape[1] // 2
    x1 = jax.nn.relu(x[:, :half] @ params["w1"] + params["b1"])
    x2 = jax.nn.relu(x[:, half:] @ params["w1"] + params["b1"])
    diff = (x1 - x2) ** 2
    y = jax.nn.sigmoid(diff @ params["w_out"] + params["b_out"])
    return y, [diff, x1, x2]


# ---------------------------------- Main --------------------------------------

if __name__ == "__main__":
    key = jax.random.PRNGKey(0)
    k_x, k_p, k_x2, k_p2 = jax.random.split(key, 4)

    # Test 1: lane-dense shapes (half_input = hidden = 128).  Default tiling
    # picks block_rows=32 -> grid=(2,), exercising the fused small-tile MXU
    # path and the >=2-grid-step guarantee for v7x megacore.
    B, input_dim, hidden, out_dim = 64, 256, 128, 4
    x = jax.random.normal(k_x, (B, input_dim), jnp.float32)
    params = make_params(k_p, input_dim, hidden, out_dim)

    out = mlp_words_forward(x, params)
    out = jax.block_until_ready(out)
    y, (diff, x1, x2) = out

    y_r, (diff_r, x1_r, x2_r) = reference_forward(x, params)
    for got, ref in ((y, y_r), (diff, diff_r), (x1, x1_r), (x2, x2_r)):
        np.testing.assert_allclose(np.asarray(got), np.asarray(ref),
                                   rtol=1e-3, atol=1e-3)
    assert y.shape == (B, out_dim)

    # Test 2: awkward shapes (B=20, half_input=120, hidden=96) exercising the
    # batch-row padding and lane-alignment padding paths.
    B2, input_dim2, hidden2, out_dim2 = 20, 240, 96, 3
    x_b = jax.random.normal(k_x2, (B2, input_dim2), jnp.float32)
    params2 = make_params(k_p2, input_dim2, hidden2, out_dim2)

    out2 = mlp_words_forward(x_b, params2)
    out2 = jax.block_until_ready(out2)
    y2, (diff2, a2, b2) = out2

    y2_r, (diff2_r, a2_r, b2_r) = reference_forward(x_b, params2)
    for got, ref in ((y2, y2_r), (diff2, diff2_r), (a2, a2_r), (b2, b2_r)):
        np.testing.assert_allclose(np.asarray(got), np.asarray(ref),
                                   rtol=1e-3, atol=1e-3)
    assert y2.shape == (B2, out_dim2)

    print("KERNEL_OK")
</pallas_src>

<mosaic_0001>
module attributes {stable_mosaic.version = 11 : i64} {
  func.func @mlp_words_kernel(%arg0: i32, %arg1: memref<32x256xf32, #tpu.memory_space<vmem>>, %arg2: memref<128x128xf32, #tpu.memory_space<vmem>>, %arg3: memref<1x128xf32, #tpu.memory_space<vmem>>, %arg4: memref<128x4xf32, #tpu.memory_space<vmem>>, %arg5: memref<1x4xf32, #tpu.memory_space<vmem>>, %arg6: memref<32x4xf32, #tpu.memory_space<vmem>>, %arg7: memref<32x128xf32, #tpu.memory_space<vmem>>, %arg8: memref<32x128xf32, #tpu.memory_space<vmem>>, %arg9: memref<32x128xf32, #tpu.memory_space<vmem>>) attributes {dimension_semantics = [#tpu.dimension_semantics<parallel>], iteration_bounds = array<i64: 2>, scalar_prefetch = 0 : i64, scratch_operands = 0 : i64, tpu.core_type = #tpu.core_type<tc>, window_params = [{transform_indices = @transform_0, window_bounds = array<i64: 32, 256>}, {pipeline_mode = #tpu.pipeline_mode<synchronous>, transform_indices = @transform_1, window_bounds = array<i64: 128, 128>}, {pipeline_mode = #tpu.pipeline_mode<synchronous>, transform_indices = @transform_2, window_bounds = array<i64: 1, 128>}, {pipeline_mode = #tpu.pipeline_mode<synchronous>, transform_indices = @transform_3, window_bounds = array<i64: 128, 4>}, {pipeline_mode = #tpu.pipeline_mode<synchronous>, transform_indices = @transform_4, window_bounds = array<i64: 1, 4>}, {transform_indices = @transform_5, window_bounds = array<i64: 32, 4>}, {transform_indices = @transform_6, window_bounds = array<i64: 32, 128>}, {transform_indices = @transform_7, window_bounds = array<i64: 32, 128>}, {transform_indices = @transform_8, window_bounds = array<i64: 32, 128>}]} {
    %c0 = arith.constant 0 : index
    %c0_0 = arith.constant 0 : index
    %0 = vector.load %arg1[%c0, %c0_0] : memref<32x256xf32, #tpu.memory_space<vmem>>, vector<32x128xf32>
    %c0_1 = arith.constant 0 : index
    %c128 = arith.constant 128 : index
    %1 = vector.load %arg1[%c0_1, %c128] : memref<32x256xf32, #tpu.memory_space<vmem>>, vector<32x128xf32>
    %c0_2 = arith.constant 0 : index
    %c0_3 = arith.constant 0 : index
    %2 = vector.load %arg2[%c0_2, %c0_3] : memref<128x128xf32, #tpu.memory_space<vmem>>, vector<128x128xf32>
    %c0_4 = arith.constant 0 : index
    %c0_5 = arith.constant 0 : index
    %3 = vector.load %arg3[%c0_4, %c0_5] : memref<1x128xf32, #tpu.memory_space<vmem>>, vector<1x128xf32>
    %4 = tpu.concatenate %0, %1 in 0 : vector<32x128xf32>, vector<32x128xf32> -> vector<64x128xf32>
    %cst = arith.constant dense<0.000000e+00> : vector<64x128xf32>
    %5 = tpu.matmul %4, %2, %cst {dimension_numbers = #tpu.dot_dimension_numbers<[1], [0], [0], [1], [0, 0, 1, 1], [], []>} : vector<64x128xf32>, vector<128x128xf32>, vector<64x128xf32> -> vector<64x128xf32>
    %6 = vector.broadcast %3 : vector<1x128xf32> to vector<64x128xf32>
    %7 = arith.addf %5, %6 : vector<64x128xf32>
    %cst_6 = arith.constant 0.000000e+00 : f32
    %8 = vector.broadcast %cst_6 : f32 to vector<64x128xf32>
    %9 = arith.maximumf %7, %8 : vector<64x128xf32>
    %10 = vector.extract_strided_slice %9 {offsets = [0, 0], sizes = [32, 128], strides = [1, 1]} : vector<64x128xf32> to vector<32x128xf32>
    %11 = vector.extract_strided_slice %9 {offsets = [32, 0], sizes = [32, 128], strides = [1, 1]} : vector<64x128xf32> to vector<32x128xf32>
    %c0_7 = arith.constant 0 : index
    %c0_8 = arith.constant 0 : index
    %12 = vector.load %arg8[%c0_7, %c0_8] : memref<32x128xf32, #tpu.memory_space<vmem>>, vector<32x128xf32>
    tpu.vector_store %arg8[%c0_7, %c0_8], %10 {strides = array<i32>} : memref<32x128xf32, #tpu.memory_space<vmem>>, vector<32x128xf32>,
    %c0_9 = arith.constant 0 : index
    %c0_10 = arith.constant 0 : index
    %13 = vector.load %arg9[%c0_9, %c0_10] : memref<32x128xf32, #tpu.memory_space<vmem>>, vector<32x128xf32>
    tpu.vector_store %arg9[%c0_9, %c0_10], %11 {strides = array<i32>} : memref<32x128xf32, #tpu.memory_space<vmem>>, vector<32x128xf32>,
    %14 = arith.subf %10, %11 : vector<32x128xf32>
    %15 = arith.mulf %14, %14 : vector<32x128xf32>
    %c0_11 = arith.constant 0 : index
    %c0_12 = arith.constant 0 : index
    %16 = vector.load %arg7[%c0_11, %c0_12] : memref<32x128xf32, #tpu.memory_space<vmem>>, vector<32x128xf32>
    tpu.vector_store %arg7[%c0_11, %c0_12], %15 {strides = array<i32>} : memref<32x128xf32, #tpu.memory_space<vmem>>, vector<32x128xf32>,
    %c0_13 = arith.constant 0 : index
    %c0_14 = arith.constant 0 : index
    %17 = vector.load %arg4[%c0_13, %c0_14] : memref<128x4xf32, #tpu.memory_space<vmem>>, vector<128x4xf32>
    %cst_15 = arith.constant dense<0.000000e+00> : vector<32x4xf32>
    %18 = tpu.matmul %15, %17, %cst_15 {dimension_numbers = #tpu.dot_dimension_numbers<[1], [0], [0], [1], [0, 0, 1, 1], [], []>} : vector<32x128xf32>, vector<128x4xf32>, vector<32x4xf32> -> vector<32x4xf32>
    %c0_16 = arith.constant 0 : index
    %c0_17 = arith.constant 0 : index
    %19 = vector.load %arg5[%c0_16, %c0_17] : memref<1x4xf32, #tpu.memory_space<vmem>>, vector<1x4xf32>
    %20 = vector.broadcast %19 : vector<1x4xf32> to vector<32x4xf32>
    %21 = arith.addf %18, %20 : vector<32x4xf32>
    %22 = arith.negf %21 : vector<32x4xf32>
    %23 = math.exp %22 : vector<32x4xf32>
    %cst_18 = arith.constant 1.000000e+00 : f32
    %24 = vector.broadcast %cst_18 : f32 to vector<32x4xf32>
    %25 = arith.addf %24, %23 : vector<32x4xf32>
    %26 = arith.divf %24, %25 : vector<32x4xf32>
    %c0_19 = arith.constant 0 : index
    %c0_20 = arith.constant 0 : index
    %27 = vector.load %arg6[%c0_19, %c0_20] : memref<32x4xf32, #tpu.memory_space<vmem>>, vector<32x4xf32>
    tpu.vector_store %arg6[%c0_19, %c0_20], %26 {strides = array<i32>} : memref<32x4xf32, #tpu.memory_space<vmem>>, vector<32x4xf32>,
    return
  }
  func.func @transform_0(%arg0: i32) -> (i32, i32) {
    %c0_i32 = arith.constant 0 : i32
    %c0_i32_0 = arith.constant 0 : i32
    return %arg0, %c0_i32 : i32, i32
  }
  func.func @transform_1(%arg0: i32) -> (i32, i32) {
    %c0_i32 = arith.constant 0 : i32
    %c0_i32_0 = arith.constant 0 : i32
    %c0_i32_1 = arith.constant 0 : i32
    return %c0_i32, %c0_i32_0 : i32, i32
  }
  func.func @transform_2(%arg0: i32) -> (i32, i32) {
    %c0_i32 = arith.constant 0 : i32
    %c0_i32_0 = arith.constant 0 : i32
    %c0_i32_1 = arith.constant 0 : i32
    return %c0_i32, %c0_i32_0 : i32, i32
  }
  func.func @transform_3(%arg0: i32) -> (i32, i32) {
    %c0_i32 = arith.constant 0 : i32
    %c0_i32_0 = arith.constant 0 : i32
    %c0_i32_1 = arith.constant 0 : i32
    return %c0_i32, %c0_i32_0 : i32, i32
  }
  func.func @transform_4(%arg0: i32) -> (i32, i32) {
    %c0_i32 = arith.constant 0 : i32
    %c0_i32_0 = arith.constant 0 : i32
    %c0_i32_1 = arith.constant 0 : i32
    return %c0_i32, %c0_i32_0 : i32, i32
  }
  func.func @transform_5(%arg0: i32) -> (i32, i32) {
    %c0_i32 = arith.constant 0 : i32
    %c0_i32_0 = arith.constant 0 : i32
    return %arg0, %c0_i32 : i32, i32
  }
  func.func @transform_6(%arg0: i32) -> (i32, i32) {
    %c0_i32 = arith.constant 0 : i32
    %c0_i32_0 = arith.constant 0 : i32
    return %arg0, %c0_i32 : i32, i32
  }
  func.func @transform_7(%arg0: i32) -> (i32, i32) {
    %c0_i32 = arith.constant 0 : i32
    %c0_i32_0 = arith.constant 0 : i32
    return %arg0, %c0_i32 : i32, i32
  }
  func.func @transform_8(%arg0: i32) -> (i32, i32) {
    %c0_i32 = arith.constant 0 : i32
    %c0_i32_0 = arith.constant 0 : i32
    return %arg0, %c0_i32 : i32, i32
  }
}

</mosaic_0001>

<bundles_post_ra>
// kernel: tpu_custom_call.1
= control target key start
LH: loop header
LB: loop body
LE: loop exit
PB: predicated region body
PF: predicated region fallthrough
CT: control target
= control target key end

     0   :  { %s1613_s0 = inlined_call_operand.vmem [shape: f32[64,256], index: 0, kind: input, shape index: {}]   ;;  %s1614_s1 = inlined_call_operand.hbm [shape: f32[128,128], index: 1, kind: input, shape index: {}]   ;;  %s1615_s2 = inlined_call_operand.vmem [shape: f32[1,128], index: 2, kind: input, shape index: {}]   ;;  %s1616_s3 = inlined_call_operand.vmem [shape: f32[128,4], index: 3, kind: input, shape index: {}]   ;;  %s1617_s4 = inlined_call_operand.vmem [shape: f32[1,4], index: 4, kind: input, shape index: {}]   ;;  %s1618_s5 = inlined_call_operand.vmem [shape: f32[64,4], index: 5, kind: output, shape index: {0}]   ;;  %s1619_s6 = inlined_call_operand.hbm [shape: f32[64,128], index: 6, kind: output, shape index: {1}]   ;;  %s1620_s7 = inlined_call_operand.hbm [shape: f32[64,128], index: 7, kind: output, shape index: {2}]   ;;  %s1621_s8 = inlined_call_operand.hbm [shape: f32[64,128], index: 8, kind: output, shape index: {3}]  }
   0x1   :  { %1624 = sst [smem:[#allocation13_spill]] %s1613_s0 }
   0x2   :  { %1625 = sst [smem:[#allocation14_spill]] %s1614_s1 }
   0x3   :  { %1626 = sst [smem:[#allocation15_spill]] %s1615_s2 }
   0x4   :  { %1627 = sst [smem:[#allocation16_spill]] %s1616_s3 }
   0x5   :  { %1628 = sst [smem:[#allocation17_spill]] %s1620_s7 }
   0x6   :  { %14 = vsyncpa [#allocation3], 0 }
   0x7   :  { %15 = vsyncpa [#allocation4], 0 }
   0x8   :  { %17 = vsyncpa [#allocation4 + $0x1], 0 }
   0x9   :  { %18 = vsyncpa [#allocation7], 0 }
   0xa   :  { %20 = vsyncpa [#allocation7 + $0x1], 0  ;;  %s1326_s27 = smov 0   ;;  %s1328_s28 = smov 0  }
   0xb   :  { %s1330_s29 = smov 0   ;;  %s1332_s30 = smov 0  }
   0xc LB: > { %s1347_s9 = sadd.s32 4294967295, %s1271_s30   ;;  %s1622_s10 = sadd.s32 4294967294, %s1271_s30   ;;  %s1271_s30 = sphi %s1332_s30, %s1645_s30   ;;  %s1267_s29 = sphi %s1330_s29, %s1644_s29   ;;  %s1263_s28 = sphi %s1328_s28, %s1643_s28   ;;  %s1259_s27 = sphi %s1326_s27, %s1642_s27  }
   0xd   : > { %s1351_s11 = sadd.s32 1, %s1271_s30   ;;  %s169_s12 = sadd.s32 1, %s1267_s29 }
   0xe   : > { %s166_s13 = ssub.s32 %s1271_s30, %s1351_s11  ;;  %p179_p0 = scmp.ne.s32.totalorder %s1267_s29, %s1263_s28 }
   0xf   : > { %p167_p1 = scmp.eq.s32.totalorder %s166_s13, 0  ;;  %p180_p2 = scmp.eq.s32.totalorder %s1347_s9, 1 }
  0x10   : > { %p185_p3 = scmp.ne.s32.totalorder %s1263_s28, %s1259_s27  ;;  %p186_p4 = scmp.eq.s32.totalorder %s1622_s10, 1 }
  0x11   : > { %s1364_s14 = scalar_select %p167_p1, %s1267_s29, %s169_s12  }
  0x12   : > { %p1366_p5 = por %p180_p2, %p179_p0  ;;  %p1370_p6 = por %p186_p4, %p185_p3 }
  0x13   : > { %1629 = sst [smem:[#allocation12_spill]] %s1364_s14  ;;  %p885_p7 = scmp.ge.s32.totalorder %s1271_s30, 1 }
  0x14   : > { %s1631_s16 = scalar_select %p1370_p6, 1, 0 }
  0x15   : > { %p245_p8 = scmp.lt.s32.totalorder %s1271_s30, 3  ;;  %p1069_p9 = scmp.eq.s32.totalorder %s1347_s9, 0 }
  0x16   : > { %s1273_s18 = smov [#allocation2]  }
  0x17   : > { %p1377_p10 = pnand %p885_p7, %p245_p8  ;;  %s257_s19 = sshll.u32 %s1273_s18, 4  ;;  %s258_s19 = int_to_ptr.vmem [resolvable:$true] %s257_s19 }
  0x18   : > { %s1136_s20 = scalar_lea.vmem %s258_s19, 2048  ;;  %p1144_p3 = scmp.lt.s32.totalorder %s258_s19, %s258_s19 }
  0x19   : > { %p1055_p11 = pneg %p1377_p10  ;;  %p1137_p0 = scmp.ne.s32.totalorder %s258_s19, %s1136_s20 }
  0x1a   : > { %p1145_p4 = scmp.lt.s32.totalorder %s1136_s20, %s1136_s20 }
  0x1b   : > { %p1056_p12 = pnand %p1069_p9, %p1055_p11 }
  0x1c   : > { %p1146_p6 = por %p1145_p4, %p1144_p3 }
  0x1d   : > { %p1127_p13 = pneg %p1056_p12 }
  0x1f   : > { %p1139_p1 = pnand %p1137_p0, %p1127_p13 }
  0x21   : > { %p1140_p2 = pneg %p1139_p1 }
  0x23   : > { %p1147_p7 = pnand %p1146_p6, %p1140_p2 }
  0x25   : > { %1150 = shalt.err (!%p1147_p7)
}
  0x26   : > { %s1274_s21 = smov 128   ;;  %s1275_s22 = smov 8  }
  0x27   : > { %s1633_s1 = sld [smem:[#allocation14_spill]] }
  0x29   : > { %292 = sbr.rel (%p1377_p10) target bundleno = 527 (0x20f), region = 40 }
  0x2d   : > { %1058 = dma.hbm_to_vmem [thread:$0]  (!%p1056_p12), %s1633_s1, 2048, %s258_s19, [#allocation3], %s1274_s21, %s1274_s21, %s1275_s22  }
  0x2e   : > { %1246 = dma.done.wait (%p1069_p9), [#allocation3], 2048  }
  0x2f   : > { %1248 = vsyncadd (%p1069_p9), [#allocation3], 4294965248  ;;  %s893_s25 = sshll.u32 %s1347_s9, 2  ;;  %v381_v0 = vld [vmem:[#allocation2 + $0x78] sm:$0xff]  ;;  %v380_v1 = vld [vmem:[#allocation2 + $0x70] sm:$0xff]  ;;  %s1634_s0 = sld [smem:[#allocation13_spill]] }
  0x30   : > { %p343_p8 = scmp.lt.s32.totalorder %s893_s25, 7  ;;  %963 = vmatprep.subr.mxu0 %v381_v0  ;;  %v379_v2 = vld [vmem:[#allocation2 + $0x68] sm:$0xff]  ;;  %v378_v3 = vld [vmem:[#allocation2 + $0x60] sm:$0xff]  ;;  %v377_v5 = vld [vmem:[#allocation2 + $0x58] sm:$0xff]  ;;  %s1635_s3 = sld [smem:[#allocation16_spill]] }
  0x31   : > { %964 = vmatpush3.msra.mxu0 %v381_v0  ;;  %v376_v6 = vld [vmem:[#allocation2 + $0x50] sm:$0xff]  ;;  %v375_v9 = vld [vmem:[#allocation2 + $0x48] sm:$0xff]  ;;  %v374_v11 = vld [vmem:[#allocation2 + $0x40] sm:$0xff]  ;;  %s1623_s18 = sand.u32 1, %s1263_s28   ;;  %s1636_s2 = sld [smem:[#allocation15_spill]] }
  0x32   : > { %s1647_s25 = smov (!%p343_p8, %s893_s25), 7  ;;  %965 = vmatprep.subr.mxu0 %v380_v1  ;;  %v373_v13 = vld [vmem:[#allocation2 + $0x38] sm:$0xff]  ;;  %v372_v15 = vld [vmem:[#allocation2 + $0x30] sm:$0xff]  ;;  %v371_v17 = vld [vmem:[#allocation2 + $0x28] sm:$0xff]  ;;  %s1465_s21 = sshll.u32 %s1623_s18, 5 }
  0x33   : > { %s915_s26 = sshll.u32 %s1647_s25, 4  ;;  %966 = vmatpush3.msra.mxu0 %v380_v1  ;;  %v370_v18 = vld [vmem:[#allocation2 + $0x20] sm:$0xff]  ;;  %v369_v19 = vld [vmem:[#allocation2 + $0x18] sm:$0xff]  ;;  %v368_v20 = vld [vmem:[#allocation2 + $0x10] sm:$0xff]  ;;  %s1468_s22 = scalar_lea.vmem [#allocation6], %s1465_s21 }
  0x34   : > { %967 = vmatprep.subr.mxu0 %v379_v2  ;;  %v367_v21 = vld [vmem:[#allocation2 + $0x8] sm:$0xff]  ;;  %v366_v22 = vld [vmem:[#allocation2] sm:$0xff]  ;;  %s1475_s23 = scalar_lea.vmem [#allocation8], %s1465_s21  ;;  %s327_s24 = scalar_lea.vmem [#allocation5], %s1465_s21 }
  0x35   : > { %s1401_s17 = scalar_lea.vmem %s1634_s0, %s915_s26  ;;  %968 = vmatpush3.msra.mxu0 %v379_v2  ;;  %s708_s26 = sshll.u32 %s1468_s22, 4  ;;  %s1484_s26 = int_to_ptr.vmem [resolvable:$true] %s708_s26 }
  0x36   : > { %v358_v4 = vld [vmem:[%s1401_s17] sm:$0xff]  ;;  %969 = vmatprep.subr.mxu0 %v378_v3  ;;  %v537_v7 = vld [vmem:[%s1635_s3 + $0x78] sm:$0xff]  ;;  %v536_v8 = vld [vmem:[%s1635_s3 + $0x70] sm:$0xff]  ;;  %s724_s12 = sshll.u32 %s1475_s23, 4  ;;  %s669_s13 = sand.u32 1, %s1347_s9   ;;  %s1488_s12 = int_to_ptr.vmem [resolvable:$true] %s724_s12 }
  0x37   : > { %995 = vmatprep.mubr.f32.mxu0 %v358_v4  ;;  %970 = vmatpush3.msra.mxu0 %v378_v3  ;;  %v535_v10 = vld [vmem:[%s1635_s3 + $0x68] sm:$0xff]  ;;  %v534_v12 = vld [vmem:[%s1635_s3 + $0x60] sm:$0xff]  ;;  %v533_v14 = vld [vmem:[%s1635_s3 + $0x58] sm:$0xff]  ;;  %s1492_s19 = sshll.u32 %s1347_s9, 9  ;;  %s1637_s7 = sld [smem:[#allocation17_spill]] }
  0x38   : > { %971 = vmatprep.subr.mxu0 %v377_v5  ;;  %1007 = vmatprep.subr.mxu1 %v537_v7  ;;  %v532_v16 = vld [vmem:[%s1635_s3 + $0x50] sm:$0xff]  ;;  %v360_v24 = vld [vmem:[%s1401_s17 + $0x20] sm:$0xff]  ;;  %v362_v26 = vld [vmem:[%s1401_s17 + $0x8] sm:$0xff] }
  0x39   : > { %972 = vmatpush3.msra.mxu0 %v377_v5  ;;  %1008 = vmatpush3.msra.mxu1 %v537_v7  ;;  %v359_v23 = vld [vmem:[%s1401_s17 + $0x10] sm:$0xff]  ;;  %v363_v27 = vld [vmem:[%s1401_s17 + $0x18] sm:$0xff]  ;;  %v364_v28 = vld [vmem:[%s1401_s17 + $0x28] sm:$0xff] }
  0x3a   : > { %973 = vmatprep.subr.mxu0 %v376_v6  ;;  %1009 = vmatprep.subr.mxu1 %v536_v8  ;;  %v361_v25 = vld [vmem:[%s1401_s17 + $0x30] sm:$0xff]  ;;  %v365_v29 = vld [vmem:[%s1401_s17 + $0x38] sm:$0xff]  ;;  %v531_v30 = vld [vmem:[%s1635_s3 + $0x48] sm:$0xff]  ;;  %s692_s17 = sshll.u32 %s327_s24, 4  ;;  %s1486_s17 = int_to_ptr.vmem [resolvable:$true] %s692_s17 }
  0x3b   : > { %974 = vmatpush3.msra.mxu0 %v376_v6  ;;  %1010 = vmatpush3.msra.mxu1 %v536_v8  ;;  %v530_v31 = vld [vmem:[%s1635_s3 + $0x40] sm:$0xff]  ;;  %v529_v32 = vld [vmem:[%s1635_s3 + $0x38] sm:$0xff]  ;;  %v528_v33 = vld [vmem:[%s1635_s3 + $0x30] sm:$0xff] }
  0x3c   : > { %975 = vmatprep.subr.mxu0 %v375_v9  ;;  %1011 = vmatprep.subr.mxu1 %v535_v10  ;;  %v527_v34 = vld [vmem:[%s1635_s3 + $0x28] sm:$0xff]  ;;  %v526_v35 = vld [vmem:[%s1635_s3 + $0x20] sm:$0xff]  ;;  %v525_v36 = vld [vmem:[%s1635_s3 + $0x18] sm:$0xff] }
  0x3d   : > { %976 = vmatpush3.msra.mxu0 %v375_v9  ;;  %1012 = vmatpush3.msra.mxu1 %v535_v10  ;;  %v524_v37 = vld [vmem:[%s1635_s3 + $0x10] sm:$0xff]  ;;  %v523_v38 = vld [vmem:[%s1635_s3 + $0x8] sm:$0xff]  ;;  %v522_v39 = vld [vmem:[%s1635_s3] sm:$0xff]  ;;  %s1498_s10 = scalar_lea.hbm %s1637_s7, %s1492_s19 }
  0x3e   : > { %977 = vmatprep.subr.mxu0 %v374_v11  ;;  %1013 = vmatprep.subr.mxu1 %v534_v12  ;;  %v898_v40 = vld [vmem:[%s1636_s2] ss:$0 sm:$0xff] }
  0x3f   : > { %978 = vmatpush3.msra.mxu0 %v374_v11  ;;  %1014 = vmatpush3.msra.mxu1 %v534_v12 }
  0x40   : > { %979 = vmatprep.subr.mxu0 %v373_v13  ;;  %1015 = vmatprep.subr.mxu1 %v533_v14 }
  0x41   : > { %980 = vmatpush3.msra.mxu0 %v373_v13  ;;  %1016 = vmatpush3.msra.mxu1 %v533_v14 }
  0x42   : > { %981 = vmatprep.subr.mxu0 %v372_v15  ;;  %1017 = vmatprep.subr.mxu1 %v532_v16 }
  0x43   : > { %982 = vmatpush3.msra.mxu0 %v372_v15  ;;  %1018 = vmatpush3.msra.mxu1 %v532_v16 }
  0x44   : > { %983 = vmatprep.subr.mxu0 %v371_v17  ;;  %1019 = vmatprep.subr.mxu1 %v531_v30 }
  0x45   : > { %984 = vmatpush3.msra.mxu0 %v371_v17  ;;  %1020 = vmatpush3.msra.mxu1 %v531_v30 }
  0x46   : > { %985 = vmatprep.subr.mxu0 %v370_v18  ;;  %1021 = vmatprep.subr.mxu1 %v530_v31 }
  0x47   : > { %986 = vmatpush3.msra.mxu0 %v370_v18  ;;  %1022 = vmatpush3.msra.mxu1 %v530_v31 }
  0x48   : > { %987 = vmatprep.subr.mxu0 %v369_v19  ;;  %1023 = vmatprep.subr.mxu1 %v529_v32 }
  0x49   : > { %988 = vmatpush3.msra.mxu0 %v369_v19  ;;  %1024 = vmatpush3.msra.mxu1 %v529_v32 }
  0x4a   : > { %989 = vmatprep.subr.mxu0 %v368_v20  ;;  %1025 = vmatprep.subr.mxu1 %v528_v33 }
  0x4b   : > { %990 = vmatpush3.msra.mxu0 %v368_v20  ;;  %1026 = vmatpush3.msra.mxu1 %v528_v33 }
  0x4c   : > { %991 = vmatprep.subr.mxu0 %v367_v21  ;;  %1027 = vmatprep.subr.mxu1 %v527_v34 }
  0x4d   : > { %992 = vmatpush3.msra.mxu0 %v367_v21  ;;  %1028 = vmatpush3.msra.mxu1 %v527_v34 }
  0x4e   : > { %993 = vmatprep.subr.mxu0 %v366_v22  ;;  %1029 = vmatprep.subr.mxu1 %v526_v35 }
  0x4f   : > { %994 = vmatpush3.msra.mxu0 %v366_v22  ;;  %1030 = vmatpush3.msra.mxu1 %v526_v35 }
  0x50   : > { %996 = vmatmul.mubr.f32.vlgmr.msra.gmra.mxu0 %v359_v23  ;;  %1031 = vmatprep.subr.mxu1 %v525_v36 }
  0x51   : > { %998 = vmatprep.mubr.f32.mxu0 %v360_v24  ;;  %1032 = vmatpush3.msra.mxu1 %v525_v36 }
  0x52   : > { %1033 = vmatprep.subr.mxu1 %v524_v37 }
  0x53   : > { %1034 = vmatpush3.msra.mxu1 %v524_v37 }
  0x54   : > { %999 = vmatmul.mubr.f32.gmra.mxu0 %v361_v25  ;;  %1035 = vmatprep.subr.mxu1 %v523_v38 }
  0x55   : > { %1001 = vmatprep.mubr.f32.mxu0 %v362_v26  ;;  %1036 = vmatpush3.msra.mxu1 %v523_v38 }
  0x56   : > { %1037 = vmatprep.subr.mxu1 %v522_v39 }
  0x57   : > { %1038 = vmatpush3.msra.mxu1 %v522_v39 }
  0x58   : > { %1002 = vmatmul.mubr.f32.gmra.mxu0 %v363_v27 }
  0x59   : > { %1004 = vmatprep.mubr.f32.mxu0 %v364_v28 }
  0x5c   : > { %1005 = vmatmul.mubr.f32.gmra.mxu0 %v365_v29 }
 0x110   : > { %v997_v41 = vpop.f32.mrf.mxu0 }
 0x111   : > { %v461_v42 = vadd.f32 %v997_v41, %v898_v40 }
 0x112   : > { %v455_v43 = vpop.f32.mrf.mxu0 }
 0x113   : > { %v495_v44 = vmax.f32 %v461_v42, 0.0  ;;  %v456_v45 = vadd.f32 %v898_v40, %v455_v43 }
 0x114   : > { %v1000_v46 = vpop.f32.mrf.mxu0 }
 0x115   : > { %503 = vst [vmem:[%s1468_s22 + $0x8] sm:$0xff] %v495_v44  ;;  %v494_v47 = vmax.f32 %v456_v45, 0.0  ;;  %v471_v48 = vadd.f32 %v1000_v46, %v898_v40 }
 0x116   : > { %v465_v49 = vpop.f32.mrf.mxu0 }
 0x117   : > { %502 = vst [vmem:[%s1468_s22] sm:$0xff] %v494_v47  ;;  %v497_v50 = vmax.f32 %v471_v48, 0.0  ;;  %v466_v51 = vadd.f32 %v898_v40, %v465_v49 }
 0x118   : > { %v1003_v52 = vpop.f32.mrf.mxu0 }
 0x119   : > { %505 = vst [vmem:[%s1468_s22 + $0x18] sm:$0xff] %v497_v50  ;;  %v496_v53 = vmax.f32 %v466_v51, 0.0  ;;  %v481_v54 = vadd.f32 %v1003_v52, %v898_v40 }
 0x11a   : > { %v475_v55 = vpop.f32.mrf.mxu0 }
 0x11b   : > { %504 = vst [vmem:[%s1468_s22 + $0x10] sm:$0xff] %v496_v53  ;;  %v499_v56 = vmax.f32 %v481_v54, 0.0  ;;  %v476_v57 = vadd.f32 %v898_v40, %v475_v55  ;;  %s1500_s22 = scalar_lea.sflag [#allocation7], %s669_s13 }
 0x11c   : > { %v1006_v58 = vpop.f32.mrf.mxu0 }
 0x11d   : > { %507 = vst [vmem:[%s1475_s23 + $0x8] sm:$0xff] %v499_v56  ;;  %v511_v59 = vsub.f32 %v495_v44, %v499_v56  ;;  %v498_v60 = vmax.f32 %v476_v57, 0.0  ;;  %v491_v61 = vadd.f32 %v1006_v58, %v898_v40 }
 0x11e   : > { %v485_v62 = vpop.f32.mrf.mxu0 }
 0x11f   : > { %v515_v63 = vmul.f32 %v511_v59, %v511_v59  ;;  %506 = vst [vmem:[%s1475_s23] sm:$0xff] %v498_v60  ;;  %v501_v0 = vmax.f32 %v491_v61, 0.0  ;;  %v486_v1 = vadd.f32 %v898_v40, %v485_v62  ;;  %v510_v2 = vsub.f32 %v494_v47, %v498_v60 }
 0x121   : > { %519 = vst [vmem:[%s327_s24 + $0x8] sm:$0xff] %v515_v63  ;;  %509 = vst [vmem:[%s1475_s23 + $0x18] sm:$0xff] %v501_v0  ;;  %v513_v3 = vsub.f32 %v497_v50, %v501_v0  ;;  %v500_v4 = vmax.f32 %v486_v1, 0.0  ;;  %v514_v5 = vmul.f32 %v510_v2, %v510_v2 }
 0x123   : > { %v517_v6 = vmul.f32 %v513_v3, %v513_v3  ;;  %508 = vst [vmem:[%s1475_s23 + $0x10] sm:$0xff] %v500_v4  ;;  %v512_v7 = vsub.f32 %v496_v53, %v500_v4  ;;  %518 = vst [vmem:[%s327_s24] sm:$0xff] %v514_v5  ;;  %1039 = vmatprep.mubr.f32.mxu1 %v514_v5  ;;  %s1151_s23 = scalar_lea.vmem %s1484_s26, 512 }
 0x124   : > { %1040 = vmatmul.mubr.f32.vlgmr.msra.gmra.mxu1 %v515_v63  ;;  %p1152_p6 = scmp.ne.s32.totalorder %s1484_s26, %s1151_s23 }
 0x125   : > { %521 = vst [vmem:[%s327_s24 + $0x18] sm:$0xff] %v517_v6  ;;  %v516_v8 = vmul.f32 %v512_v7, %v512_v7 }
 0x126   : > { %p1153_p9 = pnand %p1152_p6, %p1366_p5 }
 0x127   : > { %520 = vst [vmem:[%s327_s24 + $0x10] sm:$0xff] %v516_v8  ;;  %1042 = vmatprep.mubr.f32.mxu1 %v516_v8  ;;  %s1276_s24 = smov [#allocation6]  }
 0x128   : > { %1043 = vmatmul.mubr.f32.gmra.mxu1 %v517_v6  ;;  %p1154_p10 = pneg %p1153_p9  ;;  %s1155_s18 = sshll.u32 %s1276_s24, 4  ;;  %s1156_s18 = int_to_ptr.vmem [resolvable:$false] %s1155_s18 }
 0x129   : > { %s1157_s0 = scalar_lea.vmem %s1156_s18, 1024  ;;  %p1158_p11 = scmp.lt.s32.totalorder %s1484_s26, %s1156_s18 }
 0x12a   : > { %p1159_p12 = scmp.lt.s32.totalorder %s1157_s0, %s1151_s23 }
 0x12c   : > { %p1160_p13 = por %p1159_p12, %p1158_p11 }
 0x12e   : > { %p1161_p0 = pnand %p1160_p13, %p1154_p10 }
 0x130   : > { %1164 = shalt.err (!%p1161_p0)
}
 0x131   : > { %s1165_s9 = scalar_lea.hbm %s1498_s10, 512  ;;  %s1169_s21 = scalar_lea.hbm %s1637_s7, 1024 }
 0x132   : > { %p1166_p1 = scmp.ne.s32.totalorder %s1498_s10, %s1165_s9  ;;  %p1170_p4 = scmp.lt.s32.totalorder %s1498_s10, %s1637_s7 }
 0x133   : > { %p1171_p7 = scmp.lt.s32.totalorder %s1169_s21, %s1165_s9 }
 0x134   : > { %p1167_p2 = pnand %p1166_p1, %p1366_p5 }
 0x135   : > { %p1172_p8 = por %p1171_p7, %p1170_p4 }
 0x136   : > { %p1168_p3 = pneg %p1167_p2 }
 0x138   : > { %p1173_p6 = pnand %p1172_p8, %p1168_p3 }
 0x13a   : > { %1176 = shalt.err (!%p1173_p6)
}
 0x13b   : > { %s1277_s0 = smov 128   ;;  %s1278_s18 = smov 8  }
 0x13c   : > { %1050 = dma.vmem_to_hbm [thread:$0]  (%p1366_p5), %s1484_s26, 512, %s1498_s10, %s1500_s22, %s1277_s0, %s1277_s0, %s1278_s18  }
 0x13d   : > { %s1530_s9 = scalar_lea.hbm %s1621_s8, %s1492_s19  ;;  %s1536_s21 = scalar_lea.hbm %s1619_s6, %s1492_s19 }
 0x13e   : > { %s1638_s24 = sand.u32 1, %s1263_s28   ;;  %s1177_s3 = scalar_lea.vmem %s1486_s17, 512 }
 0x13f   : > { %s665_s2 = scalar_lea.sflag [#allocation4], %s1638_s24  ;;  %p1178_p9 = scmp.ne.s32.totalorder %s1486_s17, %s1177_s3 }
 0x140   : > { %s1279_s7 = smov [#allocation5]  }
 0x141   : > { %p1179_p10 = pnand %p1178_p9, %p1366_p5  ;;  %s1181_s14 = sshll.u32 %s1279_s7, 4  ;;  %s1182_s14 = int_to_ptr.vmem [resolvable:$false] %s1181_s14 }
 0x142   : > { %s1183_s10 = scalar_lea.vmem %s1182_s14, 1024  ;;  %p1184_p12 = scmp.lt.s32.totalorder %s1486_s17, %s1182_s14 }
 0x143   : > { %p1180_p11 = pneg %p1179_p10  ;;  %p1185_p13 = scmp.lt.s32.totalorder %s1183_s10, %s1177_s3 }
 0x145   : > { %p1186_p0 = por %p1185_p13, %p1184_p12 }
 0x147   : > { %p1187_p1 = pnand %p1186_p0, %p1180_p11 }
 0x149   : > { %1190 = shalt.err (!%p1187_p1)
}
 0x14a   : > { %s1191_s26 = scalar_lea.hbm %s1536_s21, 512  ;;  %s1195_s7 = scalar_lea.hbm %s1619_s6, 1024 }
 0x14b   : > { %p1192_p2 = scmp.ne.s32.totalorder %s1536_s21, %s1191_s26  ;;  %p1196_p7 = scmp.lt.s32.totalorder %s1536_s21, %s1619_s6 }
 0x14c   : > { %p1197_p8 = scmp.lt.s32.totalorder %s1195_s7, %s1191_s26 }
 0x14d   : > { %p1193_p3 = pnand %p1192_p2, %p1366_p5 }
 0x14e   : > { %p1198_p6 = por %p1197_p8, %p1196_p7 }
 0x14f   : > { %p1194_p4 = pneg %p1193_p3 }
 0x151   : > { %p1199_p9 = pnand %p1198_p6, %p1194_p4 }
 0x153   : > { %1202 = shalt.err (!%p1199_p9)
}
 0x154   : > { %1049 = dma.vmem_to_hbm [thread:$0]  (%p1366_p5), %s1486_s17, 512, %s1536_s21, %s665_s2, %s1277_s0, %s1277_s0, %s1278_s18  }
 0x155   : > { %s1203_s3 = scalar_lea.vmem %s1488_s12, 512  ;;  %s1280_s14 = smov [#allocation8]  }
 0x156   : > { %p1204_p10 = scmp.ne.s32.totalorder %s1488_s12, %s1203_s3  ;;  %s1207_s20 = sshll.u32 %s1280_s14, 4  ;;  %s1208_s20 = int_to_ptr.vmem [resolvable:$false] %s1207_s20 }
 0x157   : > { %s1209_s24 = scalar_lea.vmem %s1208_s20, 1024  ;;  %p1210_p13 = scmp.lt.s32.totalorder %s1488_s12, %s1208_s20 }
 0x158   : > { %p1205_p11 = pnand %p1204_p10, %p1366_p5  ;;  %p1211_p0 = scmp.lt.s32.totalorder %s1209_s24, %s1203_s3 }
 0x15a   : > { %p1206_p12 = pneg %p1205_p11  ;;  %p1212_p1 = por %p1211_p0, %p1210_p13 }
 0x15c   : > { %p1213_p2 = pnand %p1212_p1, %p1206_p12 }
 0x15e   : > { %1216 = shalt.err (!%p1213_p2)
}
 0x15f   : > { %s1217_s10 = scalar_lea.hbm %s1530_s9, 512  ;;  %s1221_s21 = scalar_lea.hbm %s1621_s8, 1024 }
 0x160   : > { %p1218_p3 = scmp.ne.s32.totalorder %s1530_s9, %s1217_s10  ;;  %p1222_p8 = scmp.lt.s32.totalorder %s1530_s9, %s1621_s8 }
 0x161   : > { %p1223_p6 = scmp.lt.s32.totalorder %s1221_s21, %s1217_s10 }
 0x162   : > { %p1219_p4 = pnand %p1218_p3, %p1366_p5 }
 0x163   : > { %p1224_p9 = por %p1223_p6, %p1222_p8 }
 0x164   : > { %p1220_p7 = pneg %p1219_p4 }
 0x166   : > { %p1225_p10 = pnand %p1224_p9, %p1220_p7 }
 0x168   : > { %1228 = shalt.err (!%p1225_p10)
}
 0x169   : > { %1051 = dma.vmem_to_hbm [thread:$0]  (%p1366_p5), %s1488_s12, 512, %s1530_s9, %s1500_s22, %s1277_s0, %s1277_s0, %s1278_s18   ;;  %vm654_vm0 = vcmask 31744  }
 0x16a   : > { %v899_v9 = vld [vmem:[%s1617_s4] ss:$0 sm:$0xff]  ;;  %s897_s15 = sshll.u32 %s1647_s25, 3 }
 0x16b   : > { %s353_s0 = scalar_lea.vmem %s1618_s5, %s897_s15 }
 0x1e4   : > { %v1041_v10 = vpop.f32.mrf.mxu1 }
 0x1e5   : > { %v617_v11 = vadd.f32 %v1041_v10, %v899_v9 }
 0x1e6   : > { %v611_v12 = vpop.f32.mrf.mxu1 }
 0x1e7   : > { %v901_v13 = vmul.f32 -1.442695, %v617_v11  ;;  %v612_v14 = vadd.f32 %v899_v9, %v611_v12 }
 0x1e8   : > { %v1044_v15 = vpop.f32.mrf.mxu1 }
 0x1e9   : > { %1109 = vpow2.f32 %v901_v13  ;;  %v900_v16 = vmul.f32 -1.442695, %v612_v14  ;;  %v627_v17 = vadd.f32 %v1044_v15, %v899_v9 }
 0x1ea   : > { %v621_v18 = vpop.f32.mrf.mxu1 }
 0x1eb   : > { %1111 = vpow2.f32 %v900_v16  ;;  %v903_v19 = vmul.f32 -1.442695, %v627_v17  ;;  %v622_v20 = vadd.f32 %v899_v9, %v621_v18 }
 0x1ed   : > { %1113 = vpow2.f32 %v903_v19  ;;  %v902_v21 = vmul.f32 -1.442695, %v622_v20 }
 0x1ef   : > { %1115 = vpow2.f32 %v902_v21 }
 0x1f6   : > { %v1110_v22 = vpop.eup %1109 }
 0x1f7   : > { %v643_v24 = vadd.f32 1.0, %v1110_v22 }
 0x1f8   : > { %v1112_v23 = vpop.eup %1111 }
 0x1f9   : > { %v642_v25 = vadd.f32 1.0, %v1112_v23 }
 0x1fa   : > { %v1114_v26 = vpop.eup %1113 }
 0x1fb   : > { %1117 = vrcp.f32 %v642_v25  ;;  %v645_v28 = vadd.f32 1.0, %v1114_v26 }
 0x1fc   : > { %v1116_v27 = vpop.eup %1115  ;;  %1119 = vrcp.f32 %v643_v24 }
 0x1fd   : > { %v644_v29 = vadd.f32 1.0, %v1116_v27 }
 0x1ff   : > { %1121 = vrcp.f32 %v644_v29 }
 0x200   : > { %1123 = vrcp.f32 %v645_v28 }
 0x208   : > { %v1118_v30 = vpop.eup %1117 }
 0x209   : > { %v1120_v31 = vpop.eup %1119  ;;  %655 = vst.msk [vmem:[%s353_s0] sm:$0xff] %vm654_vm0, %v1118_v30 }
 0x20a   : > { %656 = vst.msk [vmem:[%s353_s0 + $0x8] sm:$0xff] %vm654_vm0, %v1120_v31 }
 0x20c   : > { %v1122_v32 = vpop.eup %1121 }
 0x20d   : > { %v1124_v33 = vpop.eup %1123  ;;  %657 = vst.msk [vmem:[%s353_s0 + $0x10] sm:$0xff] %vm654_vm0, %v1122_v32 }
 0x20e   : > { %658 = vst.msk [vmem:[%s353_s0 + $0x18] sm:$0xff] %vm654_vm0, %v1124_v33 }
 0x20f PF: > { %p1071_p5 = scmp.ge.s32.totalorder %s1271_s30, 2  ;;  %s747_s18 = sand.u32 1, %s1259_s27  }
 0x210   : > { %p1639_p11 = scmp.ne.s32.totalorder %s1631_s16, 0  ;;  %s748_s25 = scalar_lea.sflag [#allocation4], %s747_s18 }
 0x212   : > { %p1060_p12 = pnand %p1071_p5, %p1639_p11 }
 0x214   : > { %p1061_p13 = pneg %p1060_p12 }
 0x216   : > { %1250 = dma.done.wait (%p1061_p13), %s748_s25, 512  }
 0x217   : > { %1252 = vsyncadd (%p1061_p13), %s748_s25, 4294966784  ;;  %s1640_s9 = sadd.s32 4294967294, %s1271_s30  }
 0x218   : > { %s756_s23 = sand.u32 1, %s1640_s9  }
 0x219   : > { %s757_s13 = scalar_lea.sflag [#allocation7], %s756_s23 }
 0x21a   : > { %1254 = dma.done.wait (%p1061_p13), %s757_s13, 1024  }
 0x21b   : > { %1256 = vsyncadd (%p1061_p13), %s757_s13, 4294966272  ;;  %s1641_s3 = sld [smem:[#allocation12_spill]]  ;;  %p23_p0 = scmp.ge.s32.totalorder %s1351_s11, 4  }
 0x21c   : > { %s1642_s27 = smov %s1263_s28  ;;  %s1643_s28 = smov %s1267_s29 }
 0x21d   : > { %s1645_s30 = smov %s1351_s11  ;;  %25 = sbr.rel (!%p23_p0) target bundleno = 12 (0xc), region = 124 }
 0x221   : > { %s1644_s29 = smov %s1641_s3 }
 0x222   :  { %771 = vsyncpa [#allocation3], 1 }
 0x223   :  { %773 = vsyncpa [#allocation3 + $0x1], 1 }
 0x224   :  { %774 = vsyncpa [#allocation4], 1 }
 0x225   :  { %776 = vsyncpa [#allocation4 + $0x1], 1 }
 0x226   :  { %777 = vsyncpa [#allocation7], 1 }
 0x227   :  { %779 = vsyncpa [#allocation7 + $0x1], 1 }

</bundles_post_ra>
